<compile_context>
chip_gen: v7x
topology: tpu7x:2x2x1
jax: 0.10.0
libtpu: 0.0.40
codegen_flags: <defaults>
</compile_context>

<pallas_src>
import functools

import jax
import jax.numpy as jnp
from jax import lax
from jax.experimental import pallas as pl
from jax.experimental.pallas import tpu as pltpu


def _round_up(x, m):
    return ((x + m - 1) // m) * m


def _l2_normalize(x, eps=1e-12):
    # NOTE: clamps the *squared* norm (x * rsqrt(max(sum x^2, eps))) whereas
    # F.normalize clamps the norm itself; identical for non-degenerate rows.
    return x * lax.rsqrt(jnp.maximum(jnp.sum(x * x, axis=1, keepdims=True), eps))


def _on_megacore_chip():
    # v7x has 2 TensorCores per chip; v5e/v6e have 1 (dimension_semantics no-op there).
    try:
        kind = jax.devices()[0].device_kind.lower()
    except Exception:
        return False
    return "v7" in kind


def lmcl_kernel(labels_ref, emb_ref, w_ref,
                logits_ref, loss_ref,
                m_scr, l_scr, lab_scr,
                *, s, margin, num_classes, c_is_padded):
    j = pl.program_id(1)
    n_c = pl.num_programs(1)
    tb, tc = logits_ref.shape
    neg_big = jnp.float32(-1e30)

    # ---- first C step for this B tile: reset the online-logsumexp accumulators.
    @pl.when(j == 0)
    def _():
        m_scr[...] = jnp.full((tb, 1), neg_big, dtype=jnp.float32)
        l_scr[...] = jnp.zeros((tb, 1), dtype=jnp.float32)
        lab_scr[...] = jnp.zeros((tb, 1), dtype=jnp.float32)

    # ---- cosine logits on the MXU: inputs are pre-normalized in the wrapper
    #      (optionally streamed as bf16), accumulate in f32, no transpose.
    logits = lax.dot_general(
        emb_ref[...], w_ref[...],
        dimension_numbers=(((1,), (1,)), ((), ())),
        preferred_element_type=jnp.float32,
    )
    logits_ref[...] = logits.astype(logits_ref.dtype)

    # ---- fused margin + online logsumexp for the cross-entropy.
    labels = labels_ref[...]                                          # (tb, 1) int32
    class_ids = j * tc + lax.broadcasted_iota(jnp.int32, (tb, tc), 1)
    label_mask = class_ids == labels
    # margin as a constant select + subtract (one mul, one select, one sub)
    m_logits = s * logits - jnp.where(label_mask, jnp.float32(s * margin), 0.0)
    if c_is_padded:  # static: only emitted when the class axis was actually padded
        m_logits = jnp.where(class_ids < num_classes, m_logits, neg_big)

    lab_scr[...] += jnp.sum(jnp.where(label_mask, m_logits, 0.0),
                            axis=1, keepdims=True)

    m_prev = m_scr[...]
    m_new = jnp.maximum(m_prev, jnp.max(m_logits, axis=1, keepdims=True))
    l_scr[...] = (l_scr[...] * jnp.exp(m_prev - m_new)
                  + jnp.sum(jnp.exp(m_logits - m_new), axis=1, keepdims=True))
    m_scr[...] = m_new

    # ---- finalize per-row loss on the last C step; mean happens in the wrapper.
    @pl.when(j == n_c - 1)
    def _():
        loss_ref[...] = m_scr[...] + jnp.log(l_scr[...]) - lab_scr[...]


def lmcl_forward(embeddings, weights, labels, *, s, margin,
                 tb=512, tc=1024,
                 stream_dtype=jnp.float32,       # bf16 halves HBM weight traffic
                 logits_dtype=jnp.float32,       # bf16 halves the logits write-back
                 vmem_tile_budget_bytes=40 * 1024 * 1024):
    """AMSoftmax / LMCL forward pass.  Returns (mean loss, cosine logits [B, C])."""
    B, E = embeddings.shape
    C, _ = weights.shape

    # --- L2-normalize ONCE (moved out of the kernel) and cast to streaming dtype.
    emb_n = _l2_normalize(embeddings.astype(jnp.float32))
    w_n = _l2_normalize(weights.astype(jnp.float32))
    if jnp.dtype(stream_dtype) != jnp.dtype(jnp.float32):
        emb_n = emb_n.astype(stream_dtype)
        w_n = w_n.astype(stream_dtype)

    in_bytes = jnp.dtype(stream_dtype).itemsize
    out_bytes = jnp.dtype(logits_dtype).itemsize

    # --- tile selection: tb (batch) large first (fewer full-weight re-reads),
    #     tc lane-dense multiple of 128; prefer a tc that divides C exactly so the
    #     class axis needs no padding and no wrapper-side logits slice.
    tb = min(tb, _round_up(B, 8))
    tc = min(tc, _round_up(C, 128))
    if C % 128 == 0 and C % tc != 0:
        cand = (tc // 128) * 128
        while cand >= 128 and C % cand != 0:
            cand -= 128
        if cand >= 128:
            tc = cand

    # v7x megacore: ensure >= 2 "parallel" B tiles so both TensorCores get work.
    if _on_megacore_chip() and _round_up(B, 8) <= tb and tb >= 16:
        tb = max(8, (tb // 16) * 8)

    def _footprint(tb_, tc_):
        return (2 * tb_ * E * in_bytes          # embeddings tile (double-buffered)
                + 2 * tc_ * E * in_bytes        # weight tile (double-buffered)
                + 2 * tb_ * tc_ * out_bytes     # logits tile (double-buffered)
                + 2 * tb_ * 4 * 2               # labels + loss blocks
                + 3 * tb_ * 4)                  # accumulator scratch

    # Shrink tc first (keeps weight-traffic amortization ~ tb), then tb.
    while _footprint(tb, tc) > vmem_tile_budget_bytes and tc > 128:
        tc = max(128, (tc // 256) * 128)
    while _footprint(tb, tc) > vmem_tile_budget_bytes and tb > 8:
        tb = max(8, (tb // 16) * 8)

    B_pad = _round_up(B, tb)
    C_pad = _round_up(C, tc)

    # --- pad only when actually needed (padded batch rows get label 0 / zero
    #     embeddings; their finite loss rows are excluded from the mean below).
    if B_pad != B:
        emb_n = jnp.pad(emb_n, ((0, B_pad - B), (0, 0)))
    if C_pad != C:
        w_n = jnp.pad(w_n, ((0, C_pad - C), (0, 0)))
    labels_i32 = labels.reshape(-1).astype(jnp.int32)
    if B_pad != B:
        labels_i32 = jnp.pad(labels_i32, (0, B_pad - B))
    labels_2d = labels_i32.reshape(B_pad, 1)

    kernel = functools.partial(
        lmcl_kernel, s=float(s), margin=float(margin),
        num_classes=C, c_is_padded=(C_pad != C))

    vmem_limit = int(max(32 * 1024 * 1024,
                         min(_footprint(tb, tc) + (16 << 20), 120 << 20)))

    logits_pad, loss_rows = pl.pallas_call(
        kernel,
        out_shape=(
            jax.ShapeDtypeStruct((B_pad, C_pad), logits_dtype),
            jax.ShapeDtypeStruct((B_pad, 1), jnp.float32),
        ),
        grid_spec=pltpu.PrefetchScalarGridSpec(
            num_scalar_prefetch=0,
            grid=(B_pad // tb, C_pad // tc),
            in_specs=[
                pl.BlockSpec((tb, 1), lambda i, j: (i, 0)),    # labels
                pl.BlockSpec((tb, E), lambda i, j: (i, 0)),    # normalized embeddings
                pl.BlockSpec((tc, E), lambda i, j: (j, 0)),    # normalized weight tile
            ],
            out_specs=(
                pl.BlockSpec((tb, tc), lambda i, j: (i, j)),   # logits (lane-dense)
                pl.BlockSpec((tb, 1), lambda i, j: (i, 0)),    # per-row loss
            ),
            scratch_shapes=[
                pltpu.VMEM((tb, 1), jnp.float32),   # running max
                pltpu.VMEM((tb, 1), jnp.float32),   # running sum-exp
                pltpu.VMEM((tb, 1), jnp.float32),   # label-logit accumulator
            ],
        ),
        compiler_params=pltpu.CompilerParams(
            dimension_semantics=("parallel", "arbitrary"),
            vmem_limit_bytes=vmem_limit,
        ),
    )(labels_2d, emb_n, w_n)

    loss_rows = loss_rows[:B] if B_pad != B else loss_rows
    loss = jnp.mean(loss_rows[:, 0])
    logits = logits_pad if (B_pad == B and C_pad == C) else logits_pad[:B, :C]
    return loss, logits


def reference_forward(embeddings, weights, labels, *, s, margin):
    eps = 1e-12
    emb_n = embeddings * lax.rsqrt(
        jnp.maximum(jnp.sum(embeddings ** 2, axis=1, keepdims=True), eps))
    w_n = weights * lax.rsqrt(
        jnp.maximum(jnp.sum(weights ** 2, axis=1, keepdims=True), eps))
    logits = emb_n @ w_n.T
    onehot = jax.nn.one_hot(labels, weights.shape[0], dtype=jnp.float32)
    m_logits = s * (logits - margin * onehot)
    logp = jax.nn.log_softmax(m_logits, axis=1)
    loss = -jnp.mean(jnp.sum(logp * onehot, axis=1))
    return loss, logits


if __name__ == "__main__":
    # Small but tiling-exercising shapes: C=200 pads to 256 -> two C tiles with tc=128,
    # so the online-logsumexp accumulation path is actually used.
    B, E, C = 8, 128, 200
    s_scale, margin = 30.0, 0.35

    key = jax.random.PRNGKey(0)
    k_emb, k_w, k_lab = jax.random.split(key, 3)

    embeddings = jax.random.normal(k_emb, (B, E), dtype=jnp.float32)
    # kaiming_normal_ on (num_classes, embedding_size): std = sqrt(2 / fan_in)
    kaiming_std = (2.0 / E) ** 0.5
    weights = kaiming_std * jax.random.normal(k_w, (C, E), dtype=jnp.float32)
    labels = jax.random.randint(k_lab, (B,), 0, C, dtype=jnp.int32)

    ref_loss, ref_logits = reference_forward(embeddings, weights, labels,
                                             s=s_scale, margin=margin)

    # f32 streaming path, small tc forced so the multi-C-tile accumulation runs.
    loss, logits = lmcl_forward(embeddings, weights, labels,
                                s=s_scale, margin=margin, tc=128)
    jax.block_until_ready((loss, logits))
    assert logits.shape == (B, C)
    assert jnp.allclose(logits, ref_logits, atol=1e-4, rtol=1e-4)
    assert jnp.allclose(loss, ref_loss, atol=1e-4, rtol=1e-4)

    # bf16 streaming path (recommended perf config on v5e/v6e/v7x); s=30 amplifies
    # bf16 input quantization, so validate with a looser tolerance.
    loss_bf, logits_bf = lmcl_forward(embeddings, weights, labels,
                                      s=s_scale, margin=margin,
                                      stream_dtype=jnp.bfloat16)
    jax.block_until_ready((loss_bf, logits_bf))
    assert jnp.allclose(logits_bf, ref_logits, atol=2e-2, rtol=0.0)
    assert jnp.allclose(loss_bf, ref_loss, atol=2e-1, rtol=0.0)

    print("KERNEL_OK")
</pallas_src>

<mosaic_0001>
module attributes {stable_mosaic.version = 11 : i64} {
  func.func @lmcl_kernel(%arg0: i32, %arg1: i32, %arg2: memref<8x1xi32, #tpu.memory_space<vmem>>, %arg3: memref<8x128xf32, #tpu.memory_space<vmem>>, %arg4: memref<128x128xf32, #tpu.memory_space<vmem>>, %arg5: memref<8x128xf32, #tpu.memory_space<vmem>>, %arg6: memref<8x1xf32, #tpu.memory_space<vmem>>, %arg7: memref<8x1xf32, #tpu.memory_space<vmem>>, %arg8: memref<8x1xf32, #tpu.memory_space<vmem>>, %arg9: memref<8x1xf32, #tpu.memory_space<vmem>>) attributes {dimension_semantics = [#tpu.dimension_semantics<parallel>, #tpu.dimension_semantics<arbitrary>], iteration_bounds = array<i64: 1, 2>, scalar_prefetch = 0 : i64, scratch_operands = 3 : i64, tpu.core_type = #tpu.core_type<tc>, window_params = [{transform_indices = @transform_0, window_bounds = array<i64: 8, 1>}, {transform_indices = @transform_1, window_bounds = array<i64: 8, 128>}, {transform_indices = @transform_2, window_bounds = array<i64: 128, 128>}, {transform_indices = @transform_3, window_bounds = array<i64: 8, 128>}, {transform_indices = @transform_4, window_bounds = array<i64: 8, 1>}]} {
    %c0_i32 = arith.constant 0 : i32
    %0 = arith.cmpi eq, %arg1, %c0_i32 : i32
    %1 = arith.extui %0 : i1 to i32
    %cst = arith.constant -1.000000e+30 : f32
    %c0_i32_0 = arith.constant 0 : i32
    %2 = arith.cmpi ne, %1, %c0_i32_0 : i32
    scf.if %2 {
      %50 = vector.broadcast %cst : f32 to vector<8x1xf32>
      %c0_30 = arith.constant 0 : index
      %c0_31 = arith.constant 0 : index
      %51 = vector.load %arg7[%c0_30, %c0_31] : memref<8x1xf32, #tpu.memory_space<vmem>>, vector<8x1xf32>
      tpu.vector_store %arg7[%c0_30, %c0_31], %50 {strides = array<i32>} : memref<8x1xf32, #tpu.memory_space<vmem>>, vector<8x1xf32>,
      %cst_32 = arith.constant 0.000000e+00 : f32
      %52 = vector.broadcast %cst_32 : f32 to vector<8x1xf32>
      %c0_33 = arith.constant 0 : index
      %c0_34 = arith.constant 0 : index
      %53 = vector.load %arg8[%c0_33, %c0_34] : memref<8x1xf32, #tpu.memory_space<vmem>>, vector<8x1xf32>
      tpu.vector_store %arg8[%c0_33, %c0_34], %52 {strides = array<i32>} : memref<8x1xf32, #tpu.memory_space<vmem>>, vector<8x1xf32>,
      %cst_35 = arith.constant 0.000000e+00 : f32
      %54 = vector.broadcast %cst_35 : f32 to vector<8x1xf32>
      %c0_36 = arith.constant 0 : index
      %c0_37 = arith.constant 0 : index
      %55 = vector.load %arg9[%c0_36, %c0_37] : memref<8x1xf32, #tpu.memory_space<vmem>>, vector<8x1xf32>
      tpu.vector_store %arg9[%c0_36, %c0_37], %54 {strides = array<i32>} : memref<8x1xf32, #tpu.memory_space<vmem>>, vector<8x1xf32>,
    } else {
    }
    %c0 = arith.constant 0 : index
    %c0_1 = arith.constant 0 : index
    %3 = vector.load %arg3[%c0, %c0_1] : memref<8x128xf32, #tpu.memory_space<vmem>>, vector<8x128xf32>
    %c0_2 = arith.constant 0 : index
    %c0_3 = arith.constant 0 : index
    %4 = vector.load %arg4[%c0_2, %c0_3] : memref<128x128xf32, #tpu.memory_space<vmem>>, vector<128x128xf32>
    %cst_4 = arith.constant dense<0.000000e+00> : vector<8x128xf32>
    %5 = tpu.matmul %3, %4, %cst_4 {dimension_numbers = #tpu.dot_dimension_numbers<[1], [1], [0], [0], [0, 0, 1, 0], [], []>} : vector<8x128xf32>, vector<128x128xf32>, vector<8x128xf32> -> vector<8x128xf32>
    %c0_5 = arith.constant 0 : index
    %c0_6 = arith.constant 0 : index
    %6 = vector.load %arg5[%c0_5, %c0_6] : memref<8x128xf32, #tpu.memory_space<vmem>>, vector<8x128xf32>
    tpu.vector_store %arg5[%c0_5, %c0_6], %5 {strides = array<i32>} : memref<8x128xf32, #tpu.memory_space<vmem>>, vector<8x128xf32>,
    %c0_7 = arith.constant 0 : index
    %c0_8 = arith.constant 0 : index
    %7 = vector.load %arg2[%c0_7, %c0_8] : memref<8x1xi32, #tpu.memory_space<vmem>>, vector<8x1xi32>
    %c128_i32 = arith.constant 128 : i32
    %8 = arith.muli %arg1, %c128_i32 : i32
    %9 = tpu.iota {dimensions = array<i32: 1>} : vector<8x128xi32>
    %10 = vector.broadcast %8 : i32 to vector<8x128xi32>
    %11 = arith.addi %10, %9 : vector<8x128xi32>
    %12 = vector.broadcast %7 : vector<8x1xi32> to vector<8x128xi32>
    %13 = arith.cmpi eq, %11, %12 : vector<8x128xi32>
    %cst_9 = arith.constant 3.000000e+01 : f32
    %14 = vector.broadcast %cst_9 : f32 to vector<8x128xf32>
    %15 = arith.mulf %14, %5 : vector<8x128xf32>
    %cst_10 = arith.constant 1.050000e+01 : f32
    %cst_11 = arith.constant 0.000000e+00 : f32
    %16 = vector.broadcast %cst_10 : f32 to vector<8x128xf32>
    %17 = vector.broadcast %cst_11 : f32 to vector<8x128xf32>
    %18 = arith.select %13, %16, %17 : vector<8x128xi1>, vector<8x128xf32>
    %19 = arith.subf %15, %18 : vector<8x128xf32>
    %c200_i32 = arith.constant 200 : i32
    %20 = vector.broadcast %c200_i32 : i32 to vector<8x128xi32>
    %21 = arith.cmpi slt, %11, %20 : vector<8x128xi32>
    %cst_12 = arith.constant -1.000000e+30 : f32
    %22 = vector.broadcast %cst_12 : f32 to vector<8x128xf32>
    %23 = arith.select %21, %19, %22 : vector<8x128xi1>, vector<8x128xf32>
    %c0_13 = arith.constant 0 : index
    %c0_14 = arith.constant 0 : index
    %24 = vector.load %arg9[%c0_13, %c0_14] : memref<8x1xf32, #tpu.memory_space<vmem>>, vector<8x1xf32>
    %cst_15 = arith.constant 0.000000e+00 : f32
    %25 = vector.broadcast %cst_15 : f32 to vector<8x128xf32>
    %26 = arith.select %13, %23, %25 : vector<8x128xi1>, vector<8x128xf32>
    %cst_16 = arith.constant dense<0.000000e+00> : vector<8xf32>
    %27 = vector.multi_reduction <add>, %26, %cst_16 [1] : vector<8x128xf32> to vector<8xf32>
    %28 = vector.shape_cast %27 : vector<8xf32> to vector<8x1xf32>
    %29 = arith.addf %24, %28 : vector<8x1xf32>
    %c0_17 = arith.constant 0 : index
    %c0_18 = arith.constant 0 : index
    %30 = vector.load %arg9[%c0_17, %c0_18] : memref<8x1xf32, #tpu.memory_space<vmem>>, vector<8x1xf32>
    tpu.vector_store %arg9[%c0_17, %c0_18], %29 {strides = array<i32>} : memref<8x1xf32, #tpu.memory_space<vmem>>, vector<8x1xf32>,
    %c0_19 = arith.constant 0 : index
    %c0_20 = arith.constant 0 : index
    %31 = vector.load %arg7[%c0_19, %c0_20] : memref<8x1xf32, #tpu.memory_space<vmem>>, vector<8x1xf32>
    %cst_21 = arith.constant dense<0xFF800000> : vector<8xf32>
    %32 = vector.multi_reduction <maximumf>, %23, %cst_21 [1] : vector<8x128xf32> to vector<8xf32>
    %33 = vector.shape_cast %32 : vector<8xf32> to vector<8x1xf32>
    %34 = arith.maximumf %31, %33 : vector<8x1xf32>
    %c0_22 = arith.constant 0 : index
    %c0_23 = arith.constant 0 : index
    %35 = vector.load %arg8[%c0_22, %c0_23] : memref<8x1xf32, #tpu.memory_space<vmem>>, vector<8x1xf32>
    %36 = arith.subf %31, %34 : vector<8x1xf32>
    %37 = math.exp %36 : vector<8x1xf32>
    %38 = arith.mulf %35, %37 : vector<8x1xf32>
    %39 = vector.broadcast %34 : vector<8x1xf32> to vector<8x128xf32>
    %40 = arith.subf %23, %39 : vector<8x128xf32>
    %41 = math.exp %40 : vector<8x128xf32>
    %cst_24 = arith.constant dense<0.000000e+00> : vector<8xf32>
    %42 = vector.multi_reduction <add>, %41, %cst_24 [1] : vector<8x128xf32> to vector<8xf32>
    %43 = vector.shape_cast %42 : vector<8xf32> to vector<8x1xf32>
    %44 = arith.addf %38, %43 : vector<8x1xf32>
    %c0_25 = arith.constant 0 : index
    %c0_26 = arith.constant 0 : index
    %45 = vector.load %arg8[%c0_25, %c0_26] : memref<8x1xf32, #tpu.memory_space<vmem>>, vector<8x1xf32>
    tpu.vector_store %arg8[%c0_25, %c0_26], %44 {strides = array<i32>} : memref<8x1xf32, #tpu.memory_space<vmem>>, vector<8x1xf32>,
    %c0_27 = arith.constant 0 : index
    %c0_28 = arith.constant 0 : index
    %46 = vector.load %arg7[%c0_27, %c0_28] : memref<8x1xf32, #tpu.memory_space<vmem>>, vector<8x1xf32>
    tpu.vector_store %arg7[%c0_27, %c0_28], %34 {strides = array<i32>} : memref<8x1xf32, #tpu.memory_space<vmem>>, vector<8x1xf32>,
    %c1_i32 = arith.constant 1 : i32
    %47 = arith.cmpi eq, %arg1, %c1_i32 : i32
    %48 = arith.extui %47 : i1 to i32
    %c0_i32_29 = arith.constant 0 : i32
    %49 = arith.cmpi ne, %48, %c0_i32_29 : i32
    scf.if %49 {
      %c0_30 = arith.constant 0 : index
      %c0_31 = arith.constant 0 : index
      %50 = vector.load %arg7[%c0_30, %c0_31] : memref<8x1xf32, #tpu.memory_space<vmem>>, vector<8x1xf32>
      %c0_32 = arith.constant 0 : index
      %c0_33 = arith.constant 0 : index
      %51 = vector.load %arg8[%c0_32, %c0_33] : memref<8x1xf32, #tpu.memory_space<vmem>>, vector<8x1xf32>
      %52 = math.log %51 : vector<8x1xf32>
      %53 = arith.addf %50, %52 : vector<8x1xf32>
      %c0_34 = arith.constant 0 : index
      %c0_35 = arith.constant 0 : index
      %54 = vector.load %arg9[%c0_34, %c0_35] : memref<8x1xf32, #tpu.memory_space<vmem>>, vector<8x1xf32>
      %55 = arith.subf %53, %54 : vector<8x1xf32>
      %c0_36 = arith.constant 0 : index
      %c0_37 = arith.constant 0 : index
      %56 = vector.load %arg6[%c0_36, %c0_37] : memref<8x1xf32, #tpu.memory_space<vmem>>, vector<8x1xf32>
      tpu.vector_store %arg6[%c0_36, %c0_37], %55 {strides = array<i32>} : memref<8x1xf32, #tpu.memory_space<vmem>>, vector<8x1xf32>,
    } else {
    }
    return
  }
  func.func @transform_0(%arg0: i32, %arg1: i32) -> (i32, i32) {
    %c0_i32 = arith.constant 0 : i32
    %c0_i32_0 = arith.constant 0 : i32
    return %arg0, %c0_i32 : i32, i32
  }
  func.func @transform_1(%arg0: i32, %arg1: i32) -> (i32, i32) {
    %c0_i32 = arith.constant 0 : i32
    %c0_i32_0 = arith.constant 0 : i32
    return %arg0, %c0_i32 : i32, i32
  }
  func.func @transform_2(%arg0: i32, %arg1: i32) -> (i32, i32) {
    %c0_i32 = arith.constant 0 : i32
    %c0_i32_0 = arith.constant 0 : i32
    return %arg1, %c0_i32 : i32, i32
  }
  func.func @transform_3(%arg0: i32, %arg1: i32) -> (i32, i32) {
    %c0_i32 = arith.constant 0 : i32
    return %arg0, %arg1 : i32, i32
  }
  func.func @transform_4(%arg0: i32, %arg1: i32) -> (i32, i32) {
    %c0_i32 = arith.constant 0 : i32
    %c0_i32_0 = arith.constant 0 : i32
    return %arg0, %c0_i32 : i32, i32
  }
}

</mosaic_0001>

<bundles_post_ra>
// kernel: tpu_custom_call.1
= control target key start
LH: loop header
LB: loop body
LE: loop exit
PB: predicated region body
PF: predicated region fallthrough
CT: control target
= control target key end

     0   :  { %10 = vsyncpa [#allocation6], 0  ;;  %s1117_s0 = inlined_call_operand.vmem [shape: s32[8,1], index: 0, kind: input, shape index: {}]   ;;  %s1118_s1 = inlined_call_operand.vmem [shape: f32[8,128], index: 1, kind: input, shape index: {}]   ;;  %s1119_s2 = inlined_call_operand.hbm [shape: f32[256,128], index: 2, kind: input, shape index: {}]   ;;  %s1120_s3 = inlined_call_operand.hbm [shape: f32[8,256], index: 3, kind: output, shape index: {0}]   ;;  %s1121_s4 = inlined_call_operand.vmem [shape: f32[8,1], index: 4, kind: output, shape index: {1}]  }
   0x1   :  { %12 = vsyncpa [#allocation6 + $0x1], 0 }
   0x2   :  { %13 = vsyncpa [#allocation7], 0 }
   0x3   :  { %15 = vsyncpa [#allocation7 + $0x1], 0  ;;  %s906_s15 = smov 0   ;;  %s908_s16 = smov 0  }
   0x4   :  { %s910_s17 = smov 0   ;;  %s912_s18 = smov 0  }
   0x5   :  { %s914_s19 = smov 0   ;;  %s916_s20 = smov 0  }
   0x6 LB: > { %s582_s21 = sadd.s32 4294967295, %s869_s20   ;;  %s583_s22 = sadd.s32 4294967294, %s869_s20   ;;  %s869_s20 = sphi %s916_s20, %s21_s20   ;;  %s865_s19 = sphi %s914_s19, %s1136_s19   ;;  %s861_s18 = sphi %s912_s18, %s1135_s18   ;;  %s857_s17 = sphi %s910_s17, %s1134_s17   ;;  %s853_s16 = sphi %s908_s16, %s1133_s16   ;;  %s849_s15 = sphi %s906_s15, %s1132_s15  }
   0x7   : > { %s30_s23 = sadd.s32 1, %s865_s19  ;;  %s92_s24 = sadd.s32 1, %s857_s17 }
   0x8   : > { %p31_p0 = scmp.ge.s32.totalorder %s30_s23, 2  ;;  %p99_p1 = scmp.ne.s32.totalorder %s857_s17, %s853_s16 }
   0x9   : > { %p100_p2 = scmp.eq.s32.totalorder %s869_s20, 0  ;;  %p105_p3 = scmp.ne.s32.totalorder %s853_s16, %s849_s15 }
   0xa   : > { %s1138_s23 = smov (%p31_p0, %s30_s23), 0  ;;  %p106_p5 = scmp.eq.s32.totalorder %s582_s21, 0 }
   0xb   : > { %p947_p4 = por %p100_p2, %p99_p1  ;;  %s89_s26 = ssub.s32 %s865_s19, %s1138_s23 }
   0xc   : > { %p131_p6 = scmp.eq.s32.totalorder %s582_s21, 1  ;;  %p90_p7 = scmp.eq.s32.totalorder %s89_s26, 0 }
   0xd   : > { %p953_p8 = por %p106_p5, %p105_p3  ;;  %p137_p10 = scmp.eq.s32.totalorder %s583_s22, 1 }
   0xe   : > { %p957_p9 = por %p131_p6, %p99_p1  ;;  %p691_p13 = scmp.lt.s32.totalorder %s869_s20, 2 }
   0xf   : > { %s962_s29 = scalar_select %p90_p7, %s857_s17, %s92_s24  }
  0x10   : > { %s1125_s28 = scalar_select %p957_p9, 1, 0 }
  0x11   : > { %p964_p11 = por %p137_p10, %p105_p3  ;;  %s197_s5 = sand.u32 1, %s857_s17  }
  0x12   : > { %s588_s6 = sshll.u32 %s197_s5, 7  ;;  %s602_s7 = sshll.u32 %s865_s19, 11 }
  0x13   : > { %s1126_s30 = scalar_select %p964_p11, 1, 0 }
  0x14   : > { %s975_s10 = scalar_lea.hbm %s1119_s2, %s602_s7  ;;  %s201_s11 = scalar_lea.vmem [#allocation5], %s588_s6 }
  0x15   : > { %s208_s12 = sshll.u32 %s201_s11, 4  ;;  %p981_p0 = pnand %p691_p13, %p947_p4  ;;  %s977_s12 = int_to_ptr.vmem [resolvable:$true] %s208_s12 }
  0x16   : > { %s986_s14 = scalar_lea.sflag [#allocation6], %s197_s5  ;;  %s757_s21 = scalar_lea.hbm %s975_s10, 2048 }
  0x17   : > { %p758_p2 = scmp.ne.s32.totalorder %s975_s10, %s757_s21  ;;  %p759_p3 = pneg %p981_p0 }
  0x18   : > { %s762_s25 = scalar_lea.hbm %s1119_s2, 4096  ;;  %p763_p4 = scmp.lt.u32.totalorder %s975_s10, %s1119_s2 }
  0x19   : > { %p760_p5 = pnand %p759_p3, %p758_p2  ;;  %p764_p7 = scmp.lt.u32.totalorder %s762_s25, %s757_s21 }
  0x1a   : > { %p766_p13 = scmp.lt.u32.totalorder %s757_s21, %s975_s10 }
  0x1b   : > { %p761_p6 = pneg %p760_p5  ;;  %p765_p10 = por %p764_p7, %p763_p4 }
  0x1d   : > { %p767_p12 = por %p766_p13, %p765_p10 }
  0x1f   : > { %p768_p1 = pnand %p767_p12, %p761_p6 }
  0x21   : > { %771 = shalt.err (!%p768_p1)
}
  0x22   : > { %s772_s5 = scalar_lea.vmem %s977_s12, 2048  ;;  %s871_s7 = smov [#allocation5]  }
  0x23   : > { %p773_p2 = scmp.ne.s32.totalorder %s977_s12, %s772_s5  ;;  %s777_s8 = sshll.u32 %s871_s7, 4  ;;  %s778_s8 = int_to_ptr.vmem [resolvable:$false] %s777_s8 }
  0x24   : > { %s779_s9 = scalar_lea.vmem %s778_s8, 4096  ;;  %p780_p9 = scmp.lt.s32.totalorder %s977_s12, %s778_s8 }
  0x25   : > { %p775_p5 = pnand %p773_p2, %p759_p3  ;;  %p781_p4 = scmp.lt.s32.totalorder %s779_s9, %s772_s5 }
  0x27   : > { %p776_p11 = pneg %p775_p5  ;;  %p782_p7 = por %p781_p4, %p780_p9 }
  0x29   : > { %p783_p10 = pnand %p782_p7, %p776_p11 }
  0x2b   : > { %786 = shalt.err (!%p783_p10)
}
  0x2c   : > { %s872_s11 = smov 128   ;;  %s873_s21 = smov 8  }
  0x2d   : > { %686 = dma.hbm_to_vmem [thread:$0]  (!%p981_p0), %s975_s10, 2048, %s977_s12, %s986_s14, %s872_s11, %s872_s11, %s873_s21  }
  0x2e   : > { %p216_p12 = scmp.lt.s32.totalorder %s869_s20, 3  ;;  %p1128_p1 = scmp.ge.s32.totalorder %s869_s20, 1 }
  0x30   : > { %p217_p3 = pnand %p1128_p1, %p216_p12 }
  0x31   : > { %s1018_s22 = sand.u32 (!%p217_p3), 1, %s853_s16  }
  0x32   : > { %220 = sbr.rel (%p217_p3) target bundleno = 832 (0x340), region = 32  ;;  %s592_s24 = sshll.u32 (!%p217_p3), %s1018_s22, 7 }
  0x33   : > { %s223_s25 = scalar_lea.sflag (!%p217_p3), [#allocation6], %s1018_s22  ;;  %s1022_s26 = scalar_lea.vmem (!%p217_p3), [#allocation5], %s592_s24 }
  0x39   : > { %840 = dma.done.wait (%p953_p8), %s223_s25, 2048  }
  0x3a   : > { %842 = vsyncadd (%p953_p8), %s223_s25, 4294965248  ;;  %s593_s10 = sshll.u32 %s1018_s22, 3  ;;  %p594_p9 = scmp.ne.s32.totalorder %s861_s18, 0 }
  0x3b   : > { %s1029_s12 = scalar_lea.vmem [#allocation8], %s593_s10  ;;  %vm280_vm0 = vcmask (!%p594_p9), 7168   ;;  %v874_v0 = vmov (!%p594_p9), -1e+30   ;;  %v875_v1 = vmov (!%p594_p9), 0.0  }
  0x3c   : > { %279 = sbr.rel (%p594_p9) target bundleno = 67 (0x43), region = 40  ;;  %281 = vst.msk [vmem:[#allocation2] sm:$0xff] (!%p594_p9), %vm280_vm0, %v874_v0  ;;  %282 = vst.msk [vmem:[#allocation3] sm:$0xff] (!%p594_p9), %vm280_vm0, %v875_v1 }
  0x3d   : > { %283 = vst.msk [vmem:[#allocation4] sm:$0xff] (!%p594_p9), %vm280_vm0, %v875_v1 }
  0x43 PF: > { %v285_v2 = vld [vmem:[%s1022_s26] sm:$0xff]  ;;  %v286_v3 = vld [vmem:[%s1022_s26 + $0x8] sm:$0xff]  ;;  %v876_v4 = vmov 0.0|0.0   ;;  %vm877_vm1 = vmmov 0   ;;  %v878_v6 = vmov 0.0   ;;  %v879_v7 = vmov 0  }
  0x44   : > { %655 = vmatprep.subr.bf16.mxu0 %v876_v4  ;;  %v656_v5 = vpack.c.bf16 %v286_v3, %v285_v2  ;;  %652 = vmatprep.mubr.msk.f32.mxu0 %vm877_vm1, %v878_v6  ;;  %v287_v8 = vld [vmem:[%s1022_s26 + $0x10] sm:$0xff]  ;;  %v288_v9 = vld [vmem:[%s1022_s26 + $0x18] sm:$0xff]  ;;  %v372_v10 = vld [vmem:[%s1117_s0] sm:$0xff]  ;;  %v374_v31 = vlaneseq  ;;  %s595_s5 = sshll.u32 %s861_s18, 7  ;;  %vm392_vm4 = vcmask 7168   ;;  %p596_p8 = scmp.ne.s32.totalorder %s861_s18, 1 }
  0x45   : > { %749 = vset.pattern.permute.xlu0 %v879_v7  ;;  %750 = vset.pattern.permute.xlu1 %v879_v7  ;;  %v659_v11 = vpack.c.bf16 %v288_v9, %v287_v8  ;;  %v289_v12 = vld [vmem:[%s1022_s26 + $0x20] sm:$0xff]  ;;  %v290_v13 = vld [vmem:[%s1022_s26 + $0x28] sm:$0xff]  ;;  %v291_v15 = vld [vmem:[%s1022_s26 + $0x30] sm:$0xff]  ;;  %v376_v33 = vstv %s595_s5 }
  0x46   : > { %657 = vmatpush3.bf16.xpose.msra.mxu0 %v656_v5  ;;  %379 = vperm.xlu0 %749, %v372_v10   ;;  %v662_v14 = vpack.c.bf16 %v290_v13, %v289_v12  ;;  %v292_v16 = vld [vmem:[%s1022_s26 + $0x38] sm:$0xff]  ;;  %v293_v18 = vld [vmem:[%s1022_s26 + $0x40] sm:$0xff]  ;;  %v294_v19 = vld [vmem:[%s1022_s26 + $0x48] sm:$0xff]  ;;  %v375_v32 = vand.u32 127, %v374_v31 }
  0x47   : > { %658 = vmatprep.subr.bf16.mxu0 %v876_v4  ;;  %v665_v17 = vpack.c.bf16 %v292_v16, %v291_v15  ;;  %v668_v20 = vpack.c.bf16 %v294_v19, %v293_v18  ;;  %v295_v21 = vld [vmem:[%s1022_s26 + $0x50] sm:$0xff]  ;;  %v296_v22 = vld [vmem:[%s1022_s26 + $0x58] sm:$0xff]  ;;  %v297_v24 = vld [vmem:[%s1022_s26 + $0x60] sm:$0xff] }
  0x48   : > { %v671_v23 = vpack.c.bf16 %v296_v22, %v295_v21  ;;  %v298_v25 = vld [vmem:[%s1022_s26 + $0x68] sm:$0xff]  ;;  %v299_v27 = vld [vmem:[%s1022_s26 + $0x70] sm:$0xff]  ;;  %v300_v28 = vld [vmem:[%s1022_s26 + $0x78] sm:$0xff]  ;;  %v377_v34 = vadd.s32 %v376_v33, %v375_v32 }
  0x49   : > { %v674_v26 = vpack.c.bf16 %v298_v25, %v297_v24  ;;  %v677_v29 = vpack.c.bf16 %v300_v28, %v299_v27  ;;  %v284_v30 = vld [vmem:[%s1118_s1] sm:$0xff]  ;;  %v387_v51 = vld [vmem:[#allocation4] sm:$0xff]  ;;  %v398_v56 = vld [vmem:[#allocation3] sm:$0xff] }
  0x4a   : > { %vm385_vm3 = vcmp.lt.s32.totalorder %v377_v34, 200  ;;  %v394_v42 = vld [vmem:[#allocation2] sm:$0xff] }
  0x4e   : > { %660 = vmatpush3.bf16.xpose.msra.mxu0 %v659_v11 }
  0x4f   : > { %661 = vmatprep.subr.bf16.mxu0 %v876_v4 }
  0x56   : > { %663 = vmatpush3.bf16.xpose.msra.mxu0 %v662_v14 }
  0x57   : > { %664 = vmatprep.subr.bf16.mxu0 %v876_v4 }
  0x5e   : > { %666 = vmatpush3.bf16.xpose.msra.mxu0 %v665_v17 }
  0x5f   : > { %667 = vmatprep.subr.bf16.mxu0 %v876_v4 }
  0x66   : > { %669 = vmatpush3.bf16.xpose.msra.mxu0 %v668_v20 }
  0x67   : > { %670 = vmatprep.subr.bf16.mxu0 %v876_v4 }
  0x6e   : > { %672 = vmatpush3.bf16.xpose.msra.mxu0 %v671_v23 }
  0x6f   : > { %673 = vmatprep.subr.bf16.mxu0 %v876_v4 }
  0x76   : > { %675 = vmatpush3.bf16.xpose.msra.mxu0 %v674_v26 }
  0x77   : > { %676 = vmatprep.subr.bf16.mxu0 %v876_v4 }
  0x7e   : > { %678 = vmatpush3.bf16.xpose.msra.mxu0 %v677_v29 }
  0x85   : > { %653 = vmatmul.mubr.f32.vlgmr.msra.gmra.mrb[0].mxu0 %v284_v30 }
  0xc5   : > { %v380_v35 = vpop.permute.xlu0 %379 }
  0xc6   : > { %vm381_vm2 = vcmp.eq.s32.totalorder %v377_v34, %v380_v35 }
  0xc7   : > { %v383_v36 = vsel %vm381_vm2, 10.5, %v878_v6 }
 0x158   : > { %v367_v37 = vpop.f32.mrb[0].mxu0 }
 0x159   : > { %371 = vst [vmem:[%s1029_s12] sm:$0xff] %v367_v37  ;;  %v382_v38 = vmul.f32 30.0, %v367_v37  ;;  %v654_v39 = vpop.f32.mrb[1].mxu0 }
 0x15b   : > { %v384_v40 = vsub.f32 %v382_v38, %v383_v36 }
 0x15d   : > { %v386_v41 = vsel %vm385_vm3, %v384_v40, -1e+30 }
 0x15e   : > { %395 = vmax.xlane.f32.xlu0 %v386_v41  ;;  %v388_v46 = vsel %vm381_vm2, %v386_v41, 0.0 }
 0x1eb   : > { %v396_v43 = vpop.xlane.xlu0 %395 }
 0x1ec   : > { %v397_v44 = vmax.f32 %v394_v42, %v396_v43 }
 0x1ee   : > { %v399_v45 = vsub.f32 %v394_v42, %v397_v44  ;;  %415 = vst.msk [vmem:[#allocation2] sm:$0xff] %vm392_vm4, %v397_v44  ;;  %405 = vperm.xlu1 %750, %v397_v44  }
 0x1f0   : > { %v400_v54 = vmul.f32 1.442695, %v399_v45 }
 0x1f5   : > { %v420_v62 = vld [vmem:[#allocation2] sm:$0xff] (!%p596_p8) }
 0x212   : > { %389 = vadd.xlane.f32.xlu1 %v388_v46 }
 0x26d   : > { %v406_v47 = vpop.permute.xlu1 %405 }
 0x26e   : > { %v408_v48 = vsub.f32 %v386_v41, %v406_v47 }
 0x270   : > { %v409_v49 = vmul.f32 1.442695, %v408_v48 }
 0x272   : > { %751 = vpow2.f32 %v409_v49 }
 0x273   : > { %753 = vpow2.f32 %v400_v54 }
 0x27c   : > { %v752_v50 = vpop.eup %751 }
 0x27d   : > { %411 = vadd.xlane.f32.xlu0 %v752_v50  ;;  %v754_v55 = vpop.eup %753 }
 0x27e   : > { %v402_v57 = vmul.f32 %v754_v55, %v398_v56 }
 0x29f   : > { %v390_v52 = vpop.xlane.xlu1 %389 }
 0x2a0   : > { %v391_v53 = vadd.f32 %v390_v52, %v387_v51 }
 0x2a2   : > { %393 = vst.msk [vmem:[#allocation4] sm:$0xff] %vm392_vm4, %v391_v53 }
 0x2a9   : > { %v425_v0 = vld [vmem:[#allocation4] sm:$0xff] (!%p596_p8) }
 0x307   : > { %419 = sbr.rel (%p596_p8) target bundleno = 807 (0x327), region = 44 }
 0x30a   : > { %v412_v58 = vpop.xlane.xlu0 %411 }
 0x30b   : > { %v413_v59 = vadd.f32 %v412_v58, %v402_v57 }
 0x30d   : > { %414 = vst.msk [vmem:[#allocation3] sm:$0xff] %vm392_vm4, %v413_v59 }
 0x314   : > { %v421_v60 = vld [vmem:[#allocation3] sm:$0xff] }
 0x315   : > { %755 = vlog2.f32 %v421_v60 }
 0x31f   : > { %v756_v61 = vpop.eup %755 }
 0x320   : > { %v423_v63 = vmul.f32 0.6931472, %v756_v61 }
 0x322   : > { %v424_v1 = vadd.f32 %v423_v63, %v420_v62 }
 0x324   : > { %v426_v2 = vsub.f32 %v424_v1, %v425_v0 }
 0x326   : > { %427 = vst.msk [vmem:[%s1121_s4] sm:$0xff] %vm392_vm4, %v426_v2 }
 0x327 PF: > { %s1073_s21 = scalar_lea.hbm %s1120_s3, %s595_s5  ;;  %s448_s24 = sshll.u32 %s1029_s12, 4  ;;  %s449_s24 = int_to_ptr.vmem [resolvable:$true] %s448_s24 }
 0x328   : > { %s429_s25 = scalar_lea.sflag [#allocation7], %s1018_s22  ;;  %s787_s26 = scalar_lea.vmem %s449_s24, 128 }
 0x329   : > { %p788_p11 = scmp.ne.s32.totalorder %s449_s24, %s787_s26  ;;  %p1129_p0 = scmp.ne.s32.totalorder %s1125_s28, 0 }
 0x32a   : > { %s880_s10 = smov [#allocation8]  }
 0x32b   : > { %p789_p6 = pnand %p788_p11, %p1129_p0  ;;  %s791_s27 = sshll.u32 %s880_s10, 4  ;;  %s792_s27 = int_to_ptr.vmem [resolvable:$false] %s791_s27 }
 0x32c   : > { %s793_s18 = scalar_lea.vmem %s792_s27, 256  ;;  %p794_p2 = scmp.lt.s32.totalorder %s449_s24, %s792_s27 }
 0x32d   : > { %p790_p13 = pneg %p789_p6  ;;  %p795_p5 = scmp.lt.s32.totalorder %s793_s18, %s787_s26 }
 0x32f   : > { %p796_p4 = por %p795_p5, %p794_p2 }
 0x331   : > { %p797_p7 = pnand %p796_p4, %p790_p13 }
 0x333   : > { %800 = shalt.err (!%p797_p7)
}
 0x334   : > { %s801_s22 = scalar_lea.hbm %s1073_s21, 128  ;;  %s805_s14 = scalar_lea.hbm %s1120_s3, 256 }
 0x335   : > { %p802_p10 = scmp.ne.s32.totalorder %s1073_s21, %s801_s22  ;;  %p806_p3 = scmp.lt.u32.totalorder %s1073_s21, %s1120_s3 }
 0x336   : > { %p807_p9 = scmp.lt.u32.totalorder %s805_s14, %s801_s22  ;;  %p809_p11 = scmp.lt.u32.totalorder %s801_s22, %s1073_s21 }
 0x337   : > { %p803_p12 = pnand %p802_p10, %p1129_p0 }
 0x338   : > { %p808_p8 = por %p807_p9, %p806_p3 }
 0x339   : > { %p804_p1 = pneg %p803_p12 }
 0x33a   : > { %p810_p6 = por %p809_p11, %p808_p8 }
 0x33c   : > { %p811_p13 = pnand %p810_p6, %p804_p1 }
 0x33e   : > { %814 = shalt.err (!%p811_p13)
}
 0x33f   : > { %681 = dma.vmem_to_hbm [thread:$0]  (%p1129_p0), %s449_s24, 128, %s1073_s21, %s429_s25  }
 0x340 PF: > { %s470_s7 = sand.u32 1, %s849_s15   ;;  %p1130_p2 = scmp.ne.s32.totalorder %s1126_s30, 0 }
 0x341   : > { %p1131_p5 = scmp.ge.s32.totalorder %s869_s20, 2  ;;  %s471_s8 = scalar_lea.sflag [#allocation7], %s470_s7 }
 0x343   : > { %p688_p4 = pnand %p1131_p5, %p1130_p2 }
 0x345   : > { %844 = dma.done.wait (!%p688_p4), %s471_s8, 128  }
 0x346   : > { %846 = vsyncadd (!%p688_p4), %s471_s8, 4294967168  ;;  %s21_s20 = sadd.s32 1, %s869_s20   ;;  %s1132_s15 = smov %s853_s16 }
 0x347   : > { %p18_p7 = scmp.ge.s32.totalorder %s21_s20, 4   ;;  %s1133_s16 = smov %s857_s17 }
 0x348   : > { %s1134_s17 = smov %s962_s29  ;;  %s1135_s18 = smov %s865_s19 }
 0x349   : > { %s1136_s19 = smov %s1138_s23  ;;  %20 = sbr.rel (!%p18_p7) target bundleno = 6 (0x6), region = 103 }
 0x350   :  { %476 = vsyncpa [#allocation6], 1 }
 0x351   :  { %478 = vsyncpa [#allocation6 + $0x1], 1 }
 0x352   :  { %479 = vsyncpa [#allocation7], 1 }
 0x353   :  { %481 = vsyncpa [#allocation7 + $0x1], 1 }

</bundles_post_ra>
